<compile_context>
chip_gen: v5e
topology: v5e:2x2
jax: 0.10.0
libtpu: 0.0.40
codegen_flags: <defaults>
</compile_context>

<pallas_src>
import functools

import jax
import jax.numpy as jnp
from jax.experimental import pallas as pl
from jax.experimental.pallas import tpu as pltpu

_LANE = 128


def _cdiv(a, b):
    return -(-a // b)


def _round_up(a, b):
    return _cdiv(a, b) * b


# ------------------------------------------------------------------ kernels --

def _layernorm_rowwise_kernel(x_ref, gb_ref, o_ref, *, eps, inv_nm1):
    """One logical row per sublane; normalize over the lane (d_hid) axis."""
    x = x_ref[...].astype(jnp.float32)                       # (tile, d_hid)
    gb = gb_ref[...]                                         # (2, d_hid) f32
    mu = jnp.mean(x, axis=-1, keepdims=True)
    diff = x - mu
    # torch.std is unbiased (N-1); eps is added to sigma, NOT to variance.
    var = jnp.sum(diff * diff, axis=-1, keepdims=True) * inv_nm1
    inv = pl.reciprocal(jnp.sqrt(var) + eps, approx=False)   # one divide per row
    ln = diff * inv
    ln = ln * gb[0:1, :] + gb[1:2, :]
    # TODO(synk): for bf16 inputs on v6e/v7x the scale/shift/residual tail could
    # stay in bf16 to halve the f32 intermediate footprint.
    o_ref[...] = (ln + x).astype(o_ref.dtype)                # residual add


def _layernorm_packed_kernel(x_ref, seg_ref, gb_ref, o_ref, *, eps, inv_n,
                             inv_nm1):
    """128//d_hid logical rows packed per physical 128-lane row (lane-dense).

    Per-segment mean / unbiased variance via ONE shared 0/1 block-diagonal
    matrix on the otherwise-idle MXU; scales folded in as scalars.  HIGHEST
    precision keeps f32-level accuracy (do not lower it); the two-pass
    (x - mu)^2 form is kept for numerical stability.
    """
    x = x_ref[...].astype(jnp.float32)                       # (tile, 128)
    seg = seg_ref[...]                                       # (128, 128) 0/1
    gb = gb_ref[...]                                         # (2, 128) f32
    mu = jnp.dot(x, seg, precision=jax.lax.Precision.HIGHEST,
                 preferred_element_type=jnp.float32) * inv_n
    diff = x - mu
    var = jnp.dot(diff * diff, seg, precision=jax.lax.Precision.HIGHEST,
                  preferred_element_type=jnp.float32) * inv_nm1
    ln = diff * pl.reciprocal(jnp.sqrt(var) + eps, approx=False)
    ln = ln * gb[0:1, :] + gb[1:2, :]
    o_ref[...] = (ln + x).astype(o_ref.dtype)                # residual add


# -------------------------------------------------------------- tile sizing --

def _vmem_capacity_bytes():
    default = 64 * 1024 * 1024            # conservative: v7x per-TensorCore VMEM
    try:
        cap = int(getattr(pltpu.get_tpu_info(), "vmem_capacity_bytes", default))
        return cap if cap > 0 else default
    except Exception:
        return default


def _pick_row_tile(n_rows, lane_width, itemsize):
    """Pick (row_tile, vmem_limit_bytes), accounting for in-kernel f32 temps."""
    sub = max(8, 32 // max(int(itemsize), 1))       # 8 f32 / 16 bf16 / 32 int8
    vmem_cap = _vmem_capacity_bytes()
    # <= 48 MiB on v7x (64 MiB part), <= 64 MiB on v5e/v6e (128 MiB parts).
    vmem_limit = min(vmem_cap * 3 // 4, 64 * 1024 * 1024)
    # Per tiled row: input + output blocks, double-buffered (4 * itemsize), plus
    # ~4 in-kernel f32 temporaries (x, diff, ln, ...) at 4 B/elem each.
    per_row = (4 * int(itemsize) + 16) * max(int(lane_width), 1)
    budget = vmem_limit * 3 // 4                    # 25% headroom on the limit
    t = max(sub, budget // per_row)
    # ~4 grid steps keep the double-buffered DMA pipeline full, but never force
    # the tile below ~512 rows (small tiles measured well under HBM roofline).
    t = min(t, max(min(t, 512), _cdiv(n_rows, 4)))
    t = min(t, _round_up(n_rows, sub))              # no point exceeding the data
    t = max(sub, (t // sub) * sub)
    # v7x megacore: guarantee >= 2 blocks whenever there is enough data so both
    # TensorCores get work (harmless no-op on single-core v5e/v6e).
    if t >= n_rows and n_rows > 2 * sub:
        t = _round_up(_cdiv(n_rows, 2), sub)
    return int(t), int(vmem_limit)


# ------------------------------------------------------------------ wrapper --

def layer_normalization(z, a_2, b_2, eps=0.001):
    """Pallas TPU implementation of LayerNormalization.forward.

    z:   (batch, seq, d_hid)
    a_2: (d_hid,) scale (gamma);  b_2: (d_hid,) shift (beta)
    """
    if z.shape[1] == 1:                 # static check, mirrors `if z.size(1)==1`
        return z

    batch, seq, d_hid = z.shape
    rows = batch * seq
    itemsize = jnp.dtype(z.dtype).itemsize
    x2d = z.reshape(rows, d_hid)
    gb = jnp.stack([a_2.astype(jnp.float32), b_2.astype(jnp.float32)])  # (2, d)
    # d_hid == 1 gives nan (unbiased std of a single element), matching torch.
    inv_nm1 = 1.0 / (float(d_hid - 1) if d_hid > 1 else float("nan"))

    use_packed = (d_hid < _LANE) and (_LANE % d_hid == 0) and (d_hid > 1)

    if use_packed:
        # ---- lane-dense path: pack g = 128//d_hid rows per physical row ----
        g = _LANE // d_hid
        pad = (-rows) % g               # pad only to a multiple of g
        # TODO(synk): handle the < g leftover rows in a tiny side call instead
        # of padding, to avoid the pad/slice HBM copies when rows % g != 0.
        if pad:
            x2d = jnp.pad(x2d, ((0, pad), (0, 0)))
        rows_p = (rows + pad) // g
        xp = x2d.reshape(rows_p, _LANE)           # free reshape (contiguous)
        tile, vmem_limit = _pick_row_tile(rows_p, _LANE, itemsize)
        grid_n = _cdiv(rows_p, tile)              # ragged last block is masked

        # Shared 0/1 block-diagonal segment matrix (128 x 128).
        lane = jnp.arange(_LANE, dtype=jnp.int32)
        seg_mat = ((lane[:, None] // d_hid) == (lane[None, :] // d_hid)
                   ).astype(jnp.float32)
        gb_t = jnp.tile(gb, (1, g))               # (2, 128)

        out_p = pl.pallas_call(
            functools.partial(_layernorm_packed_kernel, eps=float(eps),
                              inv_n=1.0 / float(d_hid), inv_nm1=inv_nm1),
            out_shape=jax.ShapeDtypeStruct((rows_p, _LANE), z.dtype),
            grid_spec=pltpu.PrefetchScalarGridSpec(
                num_scalar_prefetch=0,
                grid=(grid_n,),
                in_specs=[
                    pl.BlockSpec((tile, _LANE), lambda i: (i, 0)),
                    pl.BlockSpec((_LANE, _LANE), lambda i: (0, 0)),
                    pl.BlockSpec((2, _LANE), lambda i: (0, 0)),
                ],
                out_specs=pl.BlockSpec((tile, _LANE), lambda i: (i, 0)),
            ),
            compiler_params=pltpu.CompilerParams(
                dimension_semantics=("parallel",),
                vmem_limit_bytes=vmem_limit,
            ),
        )(xp, seg_mat, gb_t)
        out2d = out_p.reshape(rows + pad, d_hid)
        if pad:
            out2d = out2d[:rows]
        return out2d.reshape(batch, seq, d_hid)

    # ---- general row-wise path (d_hid >= 128 or not a divisor of 128) ----
    # TODO(synk): generalize lane packing via LCM(d_hid, 128) for awkward d_hid
    # (e.g. 96); with HIGHEST-precision matmuls the (LCM, LCM) segment matmul
    # turns MXU-bound for LCM > 128, so stores stay (partially) lane-sparse here.
    tile, vmem_limit = _pick_row_tile(rows, d_hid, itemsize)
    grid_n = _cdiv(rows, tile)                    # ragged last block is masked

    out2d = pl.pallas_call(
        functools.partial(_layernorm_rowwise_kernel, eps=float(eps),
                          inv_nm1=inv_nm1),
        out_shape=jax.ShapeDtypeStruct((rows, d_hid), z.dtype),
        grid_spec=pltpu.PrefetchScalarGridSpec(
            num_scalar_prefetch=0,
            grid=(grid_n,),
            in_specs=[
                pl.BlockSpec((tile, d_hid), lambda i: (i, 0)),
                pl.BlockSpec((2, d_hid), lambda i: (0, 0)),
            ],
            # TODO(synk): sweep pipeline_mode=pl.Buffered(3) on x/out for v7x
            # once tile sizes are locked (only if it stays within the budget).
            out_specs=pl.BlockSpec((tile, d_hid), lambda i: (i, 0)),
        ),
        compiler_params=pltpu.CompilerParams(
            dimension_semantics=("parallel",),
            vmem_limit_bytes=vmem_limit,
        ),
    )(x2d, gb)
    return out2d.reshape(batch, seq, d_hid)


if __name__ == "__main__":
    def reference(z, a_2, b_2, eps):
        mu = jnp.mean(z, axis=-1, keepdims=True)
        sigma = jnp.std(z, axis=-1, keepdims=True, ddof=1)
        return ((z - mu) / (sigma + eps)) * a_2 + b_2 + z

    eps = 0.001
    key = jax.random.PRNGKey(0)
    k0, k1, k2, k3, k4, k5 = jax.random.split(key, 6)

    # Primary example: batch=2, seq=8, d_hid=32 (packed lane-dense path, no pad).
    batch, seq, d_hid = 2, 8, 32
    z = jax.random.normal(k0, (batch, seq, d_hid), dtype=jnp.float32)
    a_2 = jnp.ones((d_hid,), dtype=jnp.float32)    # nn.Parameter(torch.ones)
    b_2 = jnp.zeros((d_hid,), dtype=jnp.float32)   # nn.Parameter(torch.zeros)
    out = jax.block_until_ready(layer_normalization(z, a_2, b_2, eps=eps))
    assert out.shape == z.shape
    assert jnp.allclose(out, reference(z, a_2, b_2, eps), atol=1e-5, rtol=1e-5)

    # Packed path needing a (< g)-row pad, non-trivial gamma/beta.
    z2 = jax.random.normal(k1, (2, 7, d_hid), dtype=jnp.float32)
    a2 = jax.random.normal(k2, (d_hid,), dtype=jnp.float32)
    b2 = jax.random.normal(k3, (d_hid,), dtype=jnp.float32)
    out2 = jax.block_until_ready(layer_normalization(z2, a2, b2, eps=eps))
    assert jnp.allclose(out2, reference(z2, a2, b2, eps), atol=1e-5, rtol=1e-5)

    # Packed path with multiple grid blocks and a ragged last block (no pad).
    z3 = jax.random.normal(k4, (2, 40, d_hid), dtype=jnp.float32)
    out3 = jax.block_until_ready(layer_normalization(z3, a2, b2, eps=eps))
    assert jnp.allclose(out3, reference(z3, a2, b2, eps), atol=1e-5, rtol=1e-5)

    # General row-wise path (d_hid multiple of 128) with a ragged row count.
    d4 = 256
    z4 = jax.random.normal(k5, (3, 5, d4), dtype=jnp.float32)
    a4 = jnp.ones((d4,), dtype=jnp.float32)
    b4 = jnp.zeros((d4,), dtype=jnp.float32)
    out4 = jax.block_until_ready(layer_normalization(z4, a4, b4, eps=eps))
    assert jnp.allclose(out4, reference(z4, a4, b4, eps), atol=1e-5, rtol=1e-5)

    print("KERNEL_OK")
</pallas_src>

<mosaic_0001>
module attributes {stable_mosaic.version = 11 : i64} {
  func.func @_layernorm_packed_kernel(%arg0: i32, %arg1: memref<8x128xf32, #tpu.memory_space<vmem>>, %arg2: memref<128x128xf32, #tpu.memory_space<vmem>>, %arg3: memref<2x128xf32, #tpu.memory_space<vmem>>, %arg4: memref<8x128xf32, #tpu.memory_space<vmem>>) attributes {dimension_semantics = [#tpu.dimension_semantics<parallel>], iteration_bounds = array<i64: 1>, scalar_prefetch = 0 : i64, scratch_operands = 0 : i64, tpu.core_type = #tpu.core_type<tc>, window_params = [{transform_indices = @transform_0, window_bounds = array<i64: 8, 128>}, {pipeline_mode = #tpu.pipeline_mode<synchronous>, transform_indices = @transform_1, window_bounds = array<i64: 128, 128>}, {pipeline_mode = #tpu.pipeline_mode<synchronous>, transform_indices = @transform_2, window_bounds = array<i64: 2, 128>}, {transform_indices = @transform_3, window_bounds = array<i64: 8, 128>}]} {
    %c0 = arith.constant 0 : index
    %c0_0 = arith.constant 0 : index
    %0 = vector.load %arg1[%c0, %c0_0] : memref<8x128xf32, #tpu.memory_space<vmem>>, vector<8x128xf32>
    %c0_1 = arith.constant 0 : index
    %c0_2 = arith.constant 0 : index
    %1 = vector.load %arg2[%c0_1, %c0_2] : memref<128x128xf32, #tpu.memory_space<vmem>>, vector<128x128xf32>
    %c0_3 = arith.constant 0 : index
    %c0_4 = arith.constant 0 : index
    %2 = vector.load %arg3[%c0_3, %c0_4] : memref<2x128xf32, #tpu.memory_space<vmem>>, vector<2x128xf32>
    %cst = arith.constant dense<0.000000e+00> : vector<8x128xf32>
    %3 = tpu.matmul %0, %1, %cst {dimension_numbers = #tpu.dot_dimension_numbers<[1], [0], [0], [1], [0, 0, 1, 1], [], []>, precision = #tpu.contract_precision<fp32>} : vector<8x128xf32>, vector<128x128xf32>, vector<8x128xf32> -> vector<8x128xf32>
    %cst_5 = arith.constant 3.125000e-02 : f32
    %4 = vector.broadcast %cst_5 : f32 to vector<8x128xf32>
    %5 = arith.mulf %3, %4 : vector<8x128xf32>
    %6 = arith.subf %0, %5 : vector<8x128xf32>
    %7 = arith.mulf %6, %6 : vector<8x128xf32>
    %cst_6 = arith.constant dense<0.000000e+00> : vector<8x128xf32>
    %8 = tpu.matmul %7, %1, %cst_6 {dimension_numbers = #tpu.dot_dimension_numbers<[1], [0], [0], [1], [0, 0, 1, 1], [], []>, precision = #tpu.contract_precision<fp32>} : vector<8x128xf32>, vector<128x128xf32>, vector<8x128xf32> -> vector<8x128xf32>
    %cst_7 = arith.constant 0.0322580636 : f32
    %9 = vector.broadcast %cst_7 : f32 to vector<8x128xf32>
    %10 = arith.mulf %8, %9 : vector<8x128xf32>
    %11 = math.sqrt %10 : vector<8x128xf32>
    %cst_8 = arith.constant 1.000000e-03 : f32
    %12 = vector.broadcast %cst_8 : f32 to vector<8x128xf32>
    %13 = arith.addf %11, %12 : vector<8x128xf32>
    %14 = tpu.reciprocal %13 : vector<8x128xf32> -> vector<8x128xf32>
    %15 = arith.mulf %6, %14 : vector<8x128xf32>
    %16 = vector.extract_strided_slice %2 {offsets = [0, 0], sizes = [1, 128], strides = [1, 1]} : vector<2x128xf32> to vector<1x128xf32>
    %17 = vector.broadcast %16 : vector<1x128xf32> to vector<8x128xf32>
    %18 = arith.mulf %15, %17 : vector<8x128xf32>
    %19 = vector.extract_strided_slice %2 {offsets = [1, 0], sizes = [1, 128], strides = [1, 1]} : vector<2x128xf32> to vector<1x128xf32>
    %20 = vector.broadcast %19 : vector<1x128xf32> to vector<8x128xf32>
    %21 = arith.addf %18, %20 : vector<8x128xf32>
    %22 = arith.addf %21, %0 : vector<8x128xf32>
    %c0_9 = arith.constant 0 : index
    %c0_10 = arith.constant 0 : index
    %23 = vector.load %arg4[%c0_9, %c0_10] : memref<8x128xf32, #tpu.memory_space<vmem>>, vector<8x128xf32>
    tpu.vector_store %arg4[%c0_9, %c0_10], %22 {strides = array<i32>} : memref<8x128xf32, #tpu.memory_space<vmem>>, vector<8x128xf32>,
    return
  }
  func.func @transform_0(%arg0: i32) -> (i32, i32) {
    %c0_i32 = arith.constant 0 : i32
    %c0_i32_0 = arith.constant 0 : i32
    return %arg0, %c0_i32 : i32, i32
  }
  func.func @transform_1(%arg0: i32) -> (i32, i32) {
    %c0_i32 = arith.constant 0 : i32
    %c0_i32_0 = arith.constant 0 : i32
    %c0_i32_1 = arith.constant 0 : i32
    return %c0_i32, %c0_i32_0 : i32, i32
  }
  func.func @transform_2(%arg0: i32) -> (i32, i32) {
    %c0_i32 = arith.constant 0 : i32
    %c0_i32_0 = arith.constant 0 : i32
    %c0_i32_1 = arith.constant 0 : i32
    return %c0_i32, %c0_i32_0 : i32, i32
  }
  func.func @transform_3(%arg0: i32) -> (i32, i32) {
    %c0_i32 = arith.constant 0 : i32
    %c0_i32_0 = arith.constant 0 : i32
    return %arg0, %c0_i32 : i32, i32
  }
}

</mosaic_0001>

<bundles_post_ra>
// kernel: tpu_custom_call.1
= control target key start
LH: loop header
LB: loop body
LE: loop exit
PB: predicated region body
PF: predicated region fallthrough
CT: control target
= control target key end

     0   :  { %8 = vsyncpa [#allocation3], 0  ;;  %s1374_s0 = inlined_call_operand.hbm [shape: f32[4,128], index: 0, kind: input, shape index: {}]   ;;  %s1375_s1 = inlined_call_operand.hbm [shape: f32[128,128], index: 1, kind: input, shape index: {}]   ;;  %s1376_s2 = inlined_call_operand.hbm [shape: f32[2,128], index: 2, kind: input, shape index: {}]   ;;  %s1377_s3 = inlined_call_operand.hbm [shape: f32[4,128], index: 3, kind: output, shape index: {}]  }
   0x1   :  { %9 = vsyncpa [#allocation6], 0 }
   0x2   :  { %10 = vsyncpa [#allocation4], 0  ;;  %s28_s14 = sshll.u32 %s1375_s1, 4  ;;  %s29_s14 = int_to_ptr.hbm [resolvable:$true] %s28_s14 }
   0x3   :  { %14 = vsyncadd [#allocation3], 64  ;;  %s932_s15 = smov [#allocation5]   ;;  %s15_s19 = sshll.u32 %s1374_s0, 4  ;;  %s16_s19 = int_to_ptr.hbm [resolvable:$true] %s15_s19 }
   0x4   :  { %s30_s16 = sshll.u32 %s932_s15, 4  ;;  %s933_s20 = smov 128   ;;  %s31_s16 = int_to_ptr.vmem [resolvable:$true] %s30_s16 }
   0x5   :  { %s934_s21 = smov 8   ;;  %s935_s22 = smov [#allocation2]  }
   0x6   :  { %36 = dma.hbm_to_vmem [thread:$0]  %s29_s14, 2048, %s31_s16, [#allocation6], %s933_s20, %s933_s20, %s934_s21  }
   0x7   :  { %s17_s23 = sshll.u32 %s935_s22, 4  ;;  %s936_s24 = smov 64   ;;  %s18_s23 = int_to_ptr.vmem [resolvable:$true] %s17_s23 }
   0x8   :  { %s937_s25 = smov 4   ;;  %s42_s27 = sshll.u32 %s1376_s2, 4  ;;  %s43_s27 = int_to_ptr.hbm [resolvable:$true] %s42_s27 }
   0x9   :  { %23 = dma.hbm_to_vmem [thread:$0]  %s16_s19, 64, %s18_s23, [#allocation3], %s936_s24, %s936_s24, %s937_s25  }
   0xa   :  { %s938_s28 = smov [#allocation7]  }
   0xb   :  { %s44_s0 = sshll.u32 %s938_s28, 4  ;;  %s45_s0 = int_to_ptr.vmem [resolvable:$true] %s44_s0 }
   0xc   :  { %47 = dma.hbm_to_vmem [thread:$0]  %s43_s27, 32, %s45_s0, [#allocation6]  }
   0xd   :  { %926 = dma.done.wait [#allocation3], 128  }
   0xe   :  { %927 = vsyncadd [#allocation3], 4294967168 }
   0xf   :  { %928 = dma.done.wait [#allocation6], 2080  }
  0x10   :  { %929 = vsyncadd [#allocation6], 4294965216  ;;  %v76_v0 = vld [vmem:[#allocation5 + $0x78] sm:$0xff]  ;;  %v75_v1 = vld [vmem:[#allocation5 + $0x70] sm:$0xff] }
  0x11   :  { %v74_v2 = vld [vmem:[#allocation5 + $0x68] sm:$0xff]  ;;  %v972_v3 = vand.u32 4294901760, %v76_v0  ;;  %v974_v4 = vand.u32 4294901760, %v75_v1  ;;  %v73_v6 = vld [vmem:[#allocation5 + $0x60] sm:$0xff]  ;;  %v72_v7 = vld [vmem:[#allocation5 + $0x58] sm:$0xff] }
  0x12   :  { %v976_v5 = vand.u32 4294901760, %v74_v2  ;;  %v71_v8 = vld [vmem:[#allocation5 + $0x50] sm:$0xff]  ;;  %v978_v9 = vand.u32 4294901760, %v73_v6  ;;  %v980_v10 = vand.u32 4294901760, %v72_v7  ;;  %v70_v12 = vld [vmem:[#allocation5 + $0x48] sm:$0xff]  ;;  %v69_v13 = vld [vmem:[#allocation5 + $0x40] sm:$0xff] }
  0x13   :  { %v982_v11 = vand.u32 4294901760, %v71_v8  ;;  %79 = vmatpush.msra.mxu0 %v972_v3  ;;  %v986_v14 = vsub.f32 %v76_v0, %v972_v3  ;;  %v989_v15 = vsub.f32 %v75_v1, %v974_v4  ;;  %v994_v17 = vand.u32 4294901760, %v70_v12  ;;  %v68_v18 = vld [vmem:[#allocation5 + $0x38] sm:$0xff]  ;;  %275 = vmatpush.msra.mxu3 %v972_v3  ;;  %v67_v26 = vld [vmem:[#allocation5 + $0x30] sm:$0xff]  ;;  %v66_v36 = vld [vmem:[#allocation5 + $0x28] sm:$0xff] }
  0x14   :  { %v992_v16 = vsub.f32 %v74_v2, %v976_v5  ;;  %v998_v19 = vsub.f32 %v73_v6, %v978_v9  ;;  %v1001_v20 = vsub.f32 %v72_v7, %v980_v10  ;;  %v1016_v25 = vand.u32 4294901760, %v69_v13  ;;  %v65_v42 = vld [vmem:[#allocation5 + $0x20] sm:$0xff]  ;;  %v64_v47 = vld [vmem:[#allocation5 + $0x18] sm:$0xff]  ;;  %v63_v55 = vld [vmem:[#allocation5 + $0x10] sm:$0xff] }
  0x15   :  { %v1004_v21 = vsub.f32 %v71_v8, %v982_v11  ;;  %81 = vmatpush.msra.mxu0 %v974_v4  ;;  %v1008_v22 = vand.u32 4294901760, %v986_v14  ;;  %v1011_v23 = vand.u32 4294901760, %v989_v15  ;;  %222 = vmatpush.msra.mxu2 %v986_v14  ;;  %v1022_v28 = vand.u32 4294901760, %v68_v18  ;;  %v62_v60 = vld [vmem:[#allocation5 + $0x8] sm:$0xff]  ;;  %v61_v1 = vld [vmem:[#allocation5] sm:$0xff]  ;;  %v1126_v7 = vld [vmem:[#allocation2] sm:$0xff] }
  0x16   :  { %v1014_v24 = vand.u32 4294901760, %v992_v16  ;;  %v1020_v27 = vand.u32 4294901760, %v998_v19  ;;  %v1025_v29 = vsub.f32 %v70_v12, %v994_v17  ;;  %277 = vmatpush.msra.mxu3 %v974_v4  ;;  %v1036_v33 = vand.u32 4294901760, %v1001_v20  ;;  %1393 = vst [vmem:[#allocation18_spill] sm:$0xff] %v1126_v7 }
  0x17   :  { %83 = vmatpush.msra.mxu0 %v976_v5  ;;  %v122_v30 = vsub.f32 %v986_v14, %v1008_v22  ;;  %v128_v31 = vsub.f32 %v989_v15, %v1011_v23  ;;  %225 = vmatpush.msra.mxu2 %v989_v15  ;;  %v1040_v34 = vand.u32 4294901760, %v1004_v21  ;;  %v1042_v35 = vand.u32 4294901760, %v67_v26 }
  0x18   :  { %v134_v32 = vsub.f32 %v992_v16, %v1014_v24  ;;  %279 = vmatpush.msra.mxu3 %v976_v5  ;;  %v140_v39 = vsub.f32 %v998_v19, %v1020_v27  ;;  %v1053_v40 = vsub.f32 %v69_v13, %v1016_v25  ;;  %v1057_v41 = vand.u32 4294901760, %v1025_v29 }
  0x19   :  { %v1045_v37 = vand.u32 4294901760, %v122_v30  ;;  %85 = vmatpush.msra.mxu0 %v978_v9  ;;  %v1048_v38 = vand.u32 4294901760, %v128_v31  ;;  %228 = vmatpush.msra.mxu2 %v992_v16  ;;  %v146_v44 = vsub.f32 %v1001_v20, %v1036_v33  ;;  %v1066_v45 = vand.u32 4294901760, %v66_v36 }
  0x1a   :  { %1387 = vst [vmem:[#allocation12_spill] sm:$0xff] %v1053_v40  ;;  %281 = vmatpush.msra.mxu3 %v978_v9  ;;  %v1062_v43 = vand.u32 4294901760, %v134_v32  ;;  %v1069_v46 = vsub.f32 %v68_v18, %v1022_v28  ;;  %v152_v48 = vsub.f32 %v1004_v21, %v1040_v34  ;;  %v1077_v49 = vand.u32 4294901760, %v140_v39 }
  0x1b   :  { %124 = vmatpush.msra.mxu1 %v1045_v37  ;;  %87 = vmatpush.msra.mxu0 %v980_v10  ;;  %v1080_v50 = vand.u32 4294901760, %v1053_v40  ;;  %v1082_v51 = vand.u32 4294901760, %v65_v42  ;;  %v1085_v52 = vsub.f32 %v67_v26, %v1042_v35  ;;  %v158_v53 = vsub.f32 %v1025_v29, %v1057_v41 }
  0x1c   :  { %1388 = vst [vmem:[#allocation13_spill] sm:$0xff] %v1069_v46  ;;  %231 = vmatpush.msra.mxu2 %v998_v19  ;;  %283 = vmatpush.msra.mxu3 %v980_v10  ;;  %v1089_v54 = vand.u32 4294901760, %v64_v47  ;;  %v1095_v56 = vand.u32 4294901760, %v146_v44  ;;  %v1098_v57 = vand.u32 4294901760, %v1069_v46  ;;  %v1101_v58 = vsub.f32 %v66_v36, %v1066_v45 }
  0x1d   :  { %130 = vmatpush.msra.mxu1 %v1048_v38  ;;  %89 = vmatpush.msra.mxu0 %v982_v11  ;;  %1389 = vst [vmem:[#allocation14_spill] sm:$0xff] %v1085_v52  ;;  %v1103_v59 = vand.u32 4294901760, %v152_v48  ;;  %v164_v61 = vsub.f32 %v1053_v40, %v1080_v50  ;;  %v1112_v62 = vand.u32 4294901760, %v1085_v52  ;;  %v1114_v63 = vand.u32 4294901760, %v63_v55 }
  0x1e   :  { %234 = vmatpush.msra.mxu2 %v1001_v20  ;;  %285 = vmatpush.msra.mxu3 %v982_v11  ;;  %1390 = vst [vmem:[#allocation15_spill] sm:$0xff] %v1101_v58  ;;  %v1117_v0 = vsub.f32 %v65_v42, %v1082_v51  ;;  %v1119_v2 = vand.u32 4294901760, %v158_v53  ;;  %v1122_v6 = vsub.f32 %v64_v47, %v1089_v54  ;;  %v1133_v12 = vand.u32 4294901760, %v1101_v58 }
  0x1f   :  { %136 = vmatpush.msra.mxu1 %v1062_v43  ;;  %91 = vmatpush.msra.mxu0 %v994_v17  ;;  %v170_v8 = vsub.f32 %v1069_v46, %v1098_v57  ;;  %v1135_v13 = vand.u32 4294901760, %v62_v60  ;;  %v1138_v18 = vand.u32 4294901760, %v1126_v7  ;;  %v1140_v26 = vand.u32 4294901760, %v61_v1 }
  0x20   :  { %237 = vmatpush.msra.mxu2 %v1004_v21  ;;  %287 = vmatpush.msra.mxu3 %v994_v17  ;;  %1391 = vst [vmem:[#allocation16_spill] sm:$0xff] %v1117_v0  ;;  %v1146_v30 = vand.u32 4294901760, %v164_v61  ;;  %v176_v31 = vsub.f32 %v1085_v52, %v1112_v62  ;;  %v1151_v32 = vand.u32 4294901760, %v1117_v0  ;;  %v1154_v36 = vsub.f32 %v63_v55, %v1114_v63 }
  0x21   :  { %142 = vmatpush.msra.mxu1 %v1077_v49  ;;  %93 = vmatpush.msra.mxu0 %v1016_v25  ;;  %1392 = vst [vmem:[#allocation17_spill] sm:$0xff] %v1122_v6  ;;  %v1157_v39 = vand.u32 4294901760, %v1122_v6  ;;  %v1163_v42 = vand.u32 4294901760, %v170_v8  ;;  %v182_v44 = vsub.f32 %v1101_v58, %v1133_v12  ;;  %v1168_v47 = vsub.f32 %v62_v60, %v1135_v13 }
  0x22   :  { %240 = vmatpush.msra.mxu2 %v1025_v29  ;;  %289 = vmatpush.msra.mxu3 %v1016_v25  ;;  %1394 = vst [vmem:[#allocation19_spill] sm:$0xff] %v1154_v36  ;;  %v111_v48 = vsub.f32 %v1126_v7, %v1138_v18  ;;  %v1176_v53 = vand.u32 4294901760, %v176_v31  ;;  %v188_v55 = vsub.f32 %v1117_v0, %v1151_v32  ;;  %v1181_v61 = vand.u32 4294901760, %v1154_v36 }
  0x23   :  { %148 = vmatpush.msra.mxu1 %v1095_v56  ;;  %95 = vmatpush.msra.mxu0 %v1022_v28  ;;  %v1184_v60 = vsub.f32 %v61_v1, %v1140_v26  ;;  %v1190_v8 = vand.u32 4294901760, %v182_v44  ;;  %v194_v31 = vsub.f32 %v1122_v6, %v1157_v39  ;;  %v1195_v7 = vand.u32 4294901760, %v1168_v47 }
  0x24   :  { %243 = vmatpush.msra.mxu2 %v1053_v40  ;;  %291 = vmatpush.msra.mxu3 %v1022_v28  ;;  %v1201_v1 = vand.u32 4294901760, %v188_v55  ;;  %v200_v44 = vsub.f32 %v1154_v36, %v1181_v61 }
  0x25   :  { %154 = vmatpush.msra.mxu1 %v1103_v59  ;;  %97 = vmatpush.msra.mxu0 %v1042_v35  ;;  %v206_v55 = vsub.f32 %v1168_v47, %v1195_v7 }
  0x26   :  { %246 = vmatpush.msra.mxu2 %v1069_v46  ;;  %293 = vmatpush.msra.mxu3 %v1042_v35 }
  0x27   :  { %160 = vmatpush.msra.mxu1 %v1119_v2  ;;  %99 = vmatpush.msra.mxu0 %v1066_v45 }
  0x28   :  { %249 = vmatpush.msra.mxu2 %v1085_v52  ;;  %295 = vmatpush.msra.mxu3 %v1066_v45  ;;  %v112_v52 = vand.u32 4294901760, %v111_v48 }
  0x29   :  { %166 = vmatpush.msra.mxu1 %v1146_v30  ;;  %101 = vmatpush.msra.mxu0 %v1082_v51 }
  0x2a   :  { %252 = vmatpush.msra.mxu2 %v1101_v58  ;;  %297 = vmatpush.msra.mxu3 %v1082_v51  ;;  %v1206_v58 = vand.u32 4294901760, %v1184_v60  ;;  %v113_v46 = vsub.f32 %v111_v48, %v112_v52 }
  0x2b   :  { %172 = vmatpush.msra.mxu1 %v1163_v42  ;;  %103 = vmatpush.msra.mxu0 %v1089_v54 }
  0x2c   :  { %255 = vmatpush.msra.mxu2 %v1117_v0  ;;  %299 = vmatpush.msra.mxu3 %v1089_v54  ;;  %v1212_v0 = vand.u32 4294901760, %v194_v31  ;;  %v212_v40 = vsub.f32 %v1184_v60, %v1206_v58  ;;  %v1227_v31 = vand.u32 4294901760, %v206_v55 }
  0x2d   :  { %178 = vmatpush.msra.mxu1 %v1176_v53  ;;  %105 = vmatpush.msra.mxu0 %v1114_v63 }
  0x2e   :  { %258 = vmatpush.msra.mxu2 %v1122_v6  ;;  %301 = vmatpush.msra.mxu3 %v1114_v63  ;;  %v1220_v6 = vand.u32 4294901760, %v200_v44  ;;  %v1233_v44 = vand.u32 4294901760, %v212_v40 }
  0x2f   :  { %184 = vmatpush.msra.mxu1 %v1190_v8  ;;  %107 = vmatpush.msra.mxu0 %v1135_v13 }
  0x30   :  { %261 = vmatpush.msra.mxu2 %v1154_v36  ;;  %303 = vmatpush.msra.mxu3 %v1135_v13  ;;  %v114_v36 = vand.u32 4294901760, %v113_v46 }
  0x31   :  { %190 = vmatpush.msra.mxu1 %v1201_v1  ;;  %109 = vmatpush.msra.mxu0 %v1140_v26 }
  0x32   :  { %264 = vmatpush.msra.mxu2 %v1168_v47  ;;  %305 = vmatpush.msra.mxu3 %v1140_v26 }
  0x33   :  { %316 = vmatpush.msrb.mxu0 %v1008_v22  ;;  %196 = vmatpush.msra.mxu1 %v1212_v0 }
  0x34   :  { %267 = vmatpush.msra.mxu2 %v1184_v60  ;;  %309 = vmatmul.f32.vlgmr.msra.gmra.mxu3 %v112_v52 }
  0x35   :  { %320 = vmatpush.msrb.mxu0 %v1011_v23  ;;  %202 = vmatpush.msra.mxu1 %v1220_v6 }
  0x36   :  { %270 = vmatmul.f32.vlgmr.msra.gmra.mxu2 %v111_v48  ;;  %115 = vmatmul.f32.vlgmr.msra.gmra.mxu0 %v114_v36 }
  0x37   :  { %324 = vmatpush.msrb.mxu0 %v1014_v24  ;;  %208 = vmatpush.msra.mxu1 %v1227_v31 }
  0x38   :  { %468 = vmatpush.msrb.mxu3 %v1045_v37  ;;  %423 = vmatpush.msrb.mxu2 %v972_v3 }
  0x39   :  { %328 = vmatpush.msrb.mxu0 %v1020_v27  ;;  %214 = vmatpush.msra.mxu1 %v1233_v44 }
  0x3a   :  { %216 = vmatmul.f32.vlgmr.msra.gmra.mxu1 %v1138_v18  ;;  %474 = vmatpush.msrb.mxu3 %v1048_v38 }
  0x3b   :  { %383 = vmatpush.msrb.mxu1 %v972_v3  ;;  %332 = vmatpush.msrb.mxu0 %v1036_v33 }
  0x3c   :  { %480 = vmatpush.msrb.mxu3 %v1062_v43  ;;  %425 = vmatpush.msrb.mxu2 %v974_v4 }
  0x3d   :  { %385 = vmatpush.msrb.mxu1 %v974_v4  ;;  %336 = vmatpush.msrb.mxu0 %v1040_v34 }
  0x3e   :  { %486 = vmatpush.msrb.mxu3 %v1077_v49  ;;  %427 = vmatpush.msrb.mxu2 %v976_v5 }
  0x3f   :  { %387 = vmatpush.msrb.mxu1 %v976_v5  ;;  %340 = vmatpush.msrb.mxu0 %v1057_v41 }
  0x40   :  { %492 = vmatpush.msrb.mxu3 %v1095_v56  ;;  %429 = vmatpush.msrb.mxu2 %v978_v9 }
  0x41   :  { %389 = vmatpush.msrb.mxu1 %v978_v9  ;;  %344 = vmatpush.msrb.mxu0 %v1080_v50 }
  0x42   :  { %498 = vmatpush.msrb.mxu3 %v1103_v59  ;;  %431 = vmatpush.msrb.mxu2 %v980_v10 }
  0x43   :  { %391 = vmatpush.msrb.mxu1 %v980_v10  ;;  %348 = vmatpush.msrb.mxu0 %v1098_v57 }
  0x44   :  { %504 = vmatpush.msrb.mxu3 %v1119_v2  ;;  %433 = vmatpush.msrb.mxu2 %v982_v11 }
  0x45   :  { %393 = vmatpush.msrb.mxu1 %v982_v11  ;;  %352 = vmatpush.msrb.mxu0 %v1112_v62 }
  0x46   :  { %510 = vmatpush.msrb.mxu3 %v1146_v30  ;;  %435 = vmatpush.msrb.mxu2 %v994_v17 }
  0x47   :  { %395 = vmatpush.msrb.mxu1 %v994_v17  ;;  %356 = vmatpush.msrb.mxu0 %v1133_v12 }
  0x48   :  { %516 = vmatpush.msrb.mxu3 %v1163_v42  ;;  %437 = vmatpush.msrb.mxu2 %v1016_v25 }
  0x49   :  { %397 = vmatpush.msrb.mxu1 %v1016_v25  ;;  %360 = vmatpush.msrb.mxu0 %v1151_v32 }
  0x4a   :  { %522 = vmatpush.msrb.mxu3 %v1176_v53  ;;  %439 = vmatpush.msrb.mxu2 %v1022_v28  ;;  %v77_v53 = vld [vmem:[#allocation7] sm:$0x3] }
  0x4b   :  { %399 = vmatpush.msrb.mxu1 %v1022_v28  ;;  %364 = vmatpush.msrb.mxu0 %v1157_v39 }
  0x4c   :  { %528 = vmatpush.msrb.mxu3 %v1190_v8  ;;  %441 = vmatpush.msrb.mxu2 %v1042_v35 }
  0x4d   :  { %401 = vmatpush.msrb.mxu1 %v1042_v35  ;;  %368 = vmatpush.msrb.mxu0 %v1181_v61 }
  0x4e   :  { %534 = vmatpush.msrb.mxu3 %v1201_v1  ;;  %443 = vmatpush.msrb.mxu2 %v1066_v45  ;;  %v792_v1 = vperm.slane %v77_v53, 0 }
  0x4f   :  { %403 = vmatpush.msrb.mxu1 %v1066_v45  ;;  %372 = vmatpush.msrb.mxu0 %v1195_v7 }
  0x50   :  { %540 = vmatpush.msrb.mxu3 %v1212_v0  ;;  %445 = vmatpush.msrb.mxu2 %v1082_v51 }
  0x51   :  { %405 = vmatpush.msrb.mxu1 %v1082_v51  ;;  %376 = vmatpush.msrb.mxu0 %v1206_v58 }
  0x52   :  { %378 = vmatmul.f32.vlgmr.msrb.gmra.mxu0 %v1138_v18  ;;  %546 = vmatpush.msrb.mxu3 %v1220_v6 }
  0x53   :  { %407 = vmatpush.msrb.mxu1 %v1089_v54  ;;  %566 = vmatpush.msra.mxu0 %v986_v14  ;;  %v1401_v14 = vld [vmem:[#allocation19_spill] sm:$0xff] }
  0x54   :  { %552 = vmatpush.msrb.mxu3 %v1227_v31  ;;  %447 = vmatpush.msrb.mxu2 %v1089_v54 }
  0x55   :  { %409 = vmatpush.msrb.mxu1 %v1114_v63  ;;  %569 = vmatpush.msra.mxu0 %v989_v15 }
  0x56   :  { %558 = vmatpush.msrb.mxu3 %v1233_v44  ;;  %449 = vmatpush.msrb.mxu2 %v1114_v63  ;;  %v794_v44 = vperm.slane %v77_v53, 1 }
  0x57   :  { %411 = vmatpush.msrb.mxu1 %v1135_v13  ;;  %572 = vmatpush.msra.mxu0 %v992_v16 }
  0x58   :  { %727 = vmatpush.msra.mxu3 %v972_v3  ;;  %451 = vmatpush.msrb.mxu2 %v1135_v13 }
  0x59   :  { %413 = vmatpush.msrb.mxu1 %v1140_v26  ;;  %575 = vmatpush.msra.mxu0 %v998_v19 }
  0x5a   :  { %415 = vmatmul.f32.vlgmr.msrb.gmra.mxu1 %v1138_v18  ;;  %729 = vmatpush.msra.mxu3 %v974_v4 }
  0x5b   :  { %619 = vmatpush.msra.mxu1 %v972_v3  ;;  %578 = vmatpush.msra.mxu0 %v1001_v20  ;;  %v1395_v3 = vld [vmem:[#allocation12_spill] sm:$0xff] }
  0x5c   :  { %731 = vmatpush.msra.mxu3 %v976_v5  ;;  %453 = vmatpush.msrb.mxu2 %v1140_v26 }
  0x5d   :  { %621 = vmatpush.msra.mxu1 %v974_v4  ;;  %581 = vmatpush.msra.mxu0 %v1004_v21  ;;  %v1396_v4 = vld [vmem:[#allocation13_spill] sm:$0xff] }
  0x5e   :  { %733 = vmatpush.msra.mxu3 %v978_v9  ;;  %660 = vmatpush.msra.mxu2 %v1008_v22 }
  0x5f   :  { %623 = vmatpush.msra.mxu1 %v976_v5  ;;  %584 = vmatpush.msra.mxu0 %v1025_v29  ;;  %v1397_v5 = vld [vmem:[#allocation14_spill] sm:$0xff] }
  0x60   :  { %735 = vmatpush.msra.mxu3 %v980_v10  ;;  %664 = vmatpush.msra.mxu2 %v1011_v23  ;;  %v1402_v29 = vld [vmem:[#allocation18_spill] sm:$0xff] }
  0x61   :  { %625 = vmatpush.msra.mxu1 %v978_v9  ;;  %587 = vmatpush.msra.mxu0 %v1395_v3  ;;  %v1398_v9 = vld [vmem:[#allocation15_spill] sm:$0xff] }
  0x62   :  { %737 = vmatpush.msra.mxu3 %v982_v11  ;;  %668 = vmatpush.msra.mxu2 %v1014_v24 }
  0x63   :  { %627 = vmatpush.msra.mxu1 %v980_v10  ;;  %590 = vmatpush.msra.mxu0 %v1396_v4  ;;  %v1399_v10 = vld [vmem:[#allocation16_spill] sm:$0xff] }
  0x64   :  { %739 = vmatpush.msra.mxu3 %v994_v17  ;;  %672 = vmatpush.msra.mxu2 %v1020_v27 }
  0x65   :  { %629 = vmatpush.msra.mxu1 %v982_v11  ;;  %593 = vmatpush.msra.mxu0 %v1397_v5  ;;  %v1400_v11 = vld [vmem:[#allocation17_spill] sm:$0xff] }
  0x66   :  { %741 = vmatpush.msra.mxu3 %v1016_v25  ;;  %676 = vmatpush.msra.mxu2 %v1036_v33 }
  0x67   :  { %631 = vmatpush.msra.mxu1 %v994_v17  ;;  %596 = vmatpush.msra.mxu0 %v1398_v9 }
  0x68   :  { %743 = vmatpush.msra.mxu3 %v1022_v28  ;;  %680 = vmatpush.msra.mxu2 %v1040_v34 }
  0x69   :  { %633 = vmatpush.msra.mxu1 %v1016_v25  ;;  %599 = vmatpush.msra.mxu0 %v1399_v10 }
  0x6a   :  { %745 = vmatpush.msra.mxu3 %v1042_v35  ;;  %684 = vmatpush.msra.mxu2 %v1057_v41 }
  0x6b   :  { %635 = vmatpush.msra.mxu1 %v1022_v28  ;;  %602 = vmatpush.msra.mxu0 %v1400_v11 }
  0x6c   :  { %747 = vmatpush.msra.mxu3 %v1066_v45  ;;  %688 = vmatpush.msra.mxu2 %v1080_v50 }
  0x6d   :  { %637 = vmatpush.msra.mxu1 %v1042_v35  ;;  %605 = vmatpush.msra.mxu0 %v1401_v14 }
  0x6e   :  { %749 = vmatpush.msra.mxu3 %v1082_v51  ;;  %692 = vmatpush.msra.mxu2 %v1098_v57 }
  0x6f   :  { %639 = vmatpush.msra.mxu1 %v1066_v45  ;;  %608 = vmatpush.msra.mxu0 %v1168_v47 }
  0x70   :  { %751 = vmatpush.msra.mxu3 %v1089_v54  ;;  %696 = vmatpush.msra.mxu2 %v1112_v62 }
  0x71   :  { %641 = vmatpush.msra.mxu1 %v1082_v51  ;;  %611 = vmatpush.msra.mxu0 %v1184_v60 }
  0x72   :  { %753 = vmatpush.msra.mxu3 %v1114_v63  ;;  %700 = vmatpush.msra.mxu2 %v1133_v12 }
  0x73   :  { %643 = vmatpush.msra.mxu1 %v1089_v54 }
  0x74   :  { %755 = vmatpush.msra.mxu3 %v1135_v13  ;;  %704 = vmatpush.msra.mxu2 %v1151_v32 }
  0x75   :  { %645 = vmatpush.msra.mxu1 %v1114_v63 }
  0x76   :  { %757 = vmatpush.msra.mxu3 %v1140_v26  ;;  %708 = vmatpush.msra.mxu2 %v1157_v39 }
  0x77   :  { %647 = vmatpush.msra.mxu1 %v1135_v13 }
  0x78   :  { %712 = vmatpush.msra.mxu2 %v1181_v61 }
  0x79   :  { %649 = vmatpush.msra.mxu1 %v1140_v26 }
  0x7a   :  { %716 = vmatpush.msra.mxu2 %v1195_v7 }
  0x7c   :  { %720 = vmatpush.msra.mxu2 %v1206_v58 }
  0xb3   :  { %v116_v16 = vpop.f32.mrf.mxu0 }
  0xb7   :  { %v217_v15 = vpop.f32.mrf.mxu1  ;;  %v310_v21 = vpop.f32.mrf.mxu3 }
  0xb8   :  { %v218_v17 = vadd.f32 %v217_v15, %v116_v16 }
  0xb9   :  { %v271_v19 = vpop.f32.mrf.mxu2 }
  0xba   :  { %v272_v20 = vadd.f32 %v271_v19, %v218_v17 }
  0xbc   :  { %v311_v22 = vadd.f32 %v310_v21, %v272_v20 }
  0xcf   :  { %v379_v23 = vpop.f32.mrf.mxu0 }
  0xd0   :  { %v380_v24 = vadd.f32 %v379_v23, %v311_v22 }
  0xd7   :  { %v416_v25 = vpop.f32.mrf.mxu1 }
  0xd8   :  { %v417_v27 = vadd.f32 %v416_v25, %v380_v24 }
  0xda   :  { %v419_v28 = vmul.f32 0.03125, %v417_v27 }
  0xdc   :  { %v420_v33 = vsub.f32 %v1402_v29, %v419_v28 }
  0xde   :  { %v421_v34 = vmul.f32 %v420_v33, %v420_v33 }
  0xe0   :  { %v454_v35 = vand.u32 4294901760, %v421_v34 }
  0xe2   :  { %v455_v37 = vsub.f32 %v421_v34, %v454_v35  ;;  %560 = vmatmul.f32.vlgmr.msrb.gmra.mxu3 %v454_v35 }
  0xe4   :  { %614 = vmatmul.f32.vlgmr.msra.gmra.mxu0 %v455_v37  ;;  %v456_v38 = vand.u32 4294901760, %v455_v37 }
  0xe6   :  { %653 = vmatmul.f32.vlgmr.msra.gmra.mxu1 %v456_v38  ;;  %v457_v40 = vsub.f32 %v455_v37, %v456_v38 }
  0xe8   :  { %v458_v41 = vand.u32 4294901760, %v457_v40 }
  0xea   :  { %459 = vmatmul.f32.vlgmr.msrb.gmra.mxu2 %v458_v41  ;;  %759 = vmatmul.f32.vlgmr.msra.gmra.mxu3 %v454_v35 }
  0xf2   :  { %722 = vmatmul.f32.vlgmr.msra.gmra.mxu2 %v454_v35 }
 0x161   :  { %v615_v49 = vpop.f32.mrf.mxu0 }
 0x163   :  { %v654_v51 = vpop.f32.mrf.mxu1 }
 0x165   :  { %v561_v43 = vpop.f32.mrf.mxu3 }
 0x16d   :  { %v460_v45 = vpop.f32.mrf.mxu2  ;;  %v760_v57 = vpop.f32.mrf.mxu3 }
 0x16e   :  { %v562_v46 = vadd.f32 %v561_v43, %v460_v45 }
 0x170   :  { %v616_v50 = vadd.f32 %v615_v49, %v562_v46 }
 0x172   :  { %v655_v52 = vadd.f32 %v654_v51, %v616_v50 }
 0x175   :  { %v723_v54 = vpop.f32.mrf.mxu2 }
 0x176   :  { %v724_v56 = vadd.f32 %v723_v54, %v655_v52 }
 0x178   :  { %v761_v58 = vadd.f32 %v760_v57, %v724_v56 }
 0x17a   :  { %v763_v59 = vmul.f32 0.032258064, %v761_v58 }
 0x17c   :  { %826 = vrsqrt.f32 %v763_v59  ;;  %vm771_vm0 = vcmp.eq.f32.partialorder %v763_v59, inf  ;;  %v774_v13 = vand.u32 2147483648, %v763_v59  ;;  %vm773_vm1 = vcmp.eq.f32.partialorder %v763_v59, 0.0 }
 0x182   :  { %v827_v62 = vpop.eup %826 }
 0x183   :  { %v765_v63 = vmul.f32 %v827_v62, %v763_v59 }
 0x185   :  { %v766_v0 = vmul.f32 %v827_v62, %v765_v63 }
 0x187   :  { %v767_v2 = vmul.f32 0.5, %v766_v0 }
 0x189   :  { %v768_v6 = vsub.f32 1.5, %v767_v2 }
 0x18b   :  { %v769_v7 = vmul.f32 %v827_v62, %v768_v6 }
 0x18d   :  { %v770_v12 = vmul.f32 %v769_v7, %v763_v59 }
 0x18f   :  { %v772_v18 = vsel %vm771_vm0, %v763_v59, %v770_v12 }
 0x190   :  { %v775_v26 = vsel %vm773_vm1, %v774_v13, %v772_v18 }
 0x191   :  { %v776_v30 = vadd.f32 0.001, %v775_v26 }
 0x193   :  { %828 = vrcp.f32 %v776_v30  ;;  %v788_v42 = vand.u32 2147483648, %v776_v30  ;;  %v786_v48 = vand.u32 2147483647, %v776_v30  ;;  %vm782_vm3 = vweird.f32 %v776_v30 }
 0x195   :  { %v789_v60 = vor.u32 1.1754944e-38, %v788_v42  ;;  %vm787_vm5 = vcmp.eq.f32.partialorder %v786_v48, 8.507059e+37 }
 0x199   :  { %v829_v32 = vpop.eup %828 }
 0x19a   :  { %v778_v36 = vmul.f32 %v829_v32, %v776_v30  ;;  %vm783_vm2 = vweird.f32 %v829_v32 }
 0x19b   :  { %vm784_vm4 = vmor %vm782_vm3, %vm783_vm2 }
 0x19c   :  { %v779_v39 = vsub.f32 1.0, %v778_v36 }
 0x19e   :  { %v780_v47 = vmul.f32 %v829_v32, %v779_v39 }
 0x1a0   :  { %v781_v61 = vadd.f32 %v829_v32, %v780_v47 }
 0x1a2   :  { %v785_v8 = vsel %vm784_vm4, %v829_v32, %v781_v61 }
 0x1a3   :  { %v790_v55 = vsel %vm787_vm5, %v789_v60, %v785_v8 }
 0x1a4   :  { %v791_v31 = vmul.f32 %v790_v55, %v420_v33 }
 0x1a6   :  { %v793_v3 = vmul.f32 %v792_v1, %v791_v31 }
 0x1a8   :  { %v795_v4 = vadd.f32 %v794_v44, %v793_v3 }
 0x1aa   :  { %v796_v5 = vadd.f32 %v795_v4, %v1402_v29 }
 0x1ac   :  { %797 = vst [vmem:[#allocation8] sm:$0xff] %v796_v5 }
 0x1ad   :  { %801 = vsyncadd [#allocation4], 64  ;;  %s804_s30 = sshll.u32 %s1377_s3, 4  ;;  %s939_s4 = smov [#allocation8]   ;;  %s805_s30 = int_to_ptr.hbm [resolvable:$true] %s804_s30 }
 0x1ae   :  { %s802_s5 = sshll.u32 %s939_s4, 4  ;;  %s803_s5 = int_to_ptr.vmem [resolvable:$true] %s802_s5 }
 0x1af   :  { %810 = dma.vmem_to_hbm [thread:$0]  %s803_s5, 64, %s805_s30, [#allocation4], %s936_s24, %s936_s24, %s937_s25  }
 0x1b0   :  { %930 = dma.done.wait [#allocation4], 128  }
 0x1b1   :  { %931 = vsyncadd [#allocation4], 4294967168 }
 0x1b2   :  { %815 = vsyncpa [#allocation3], 1 }
 0x1b3   :  { %816 = vsyncpa [#allocation6], 1 }
 0x1b4   :  { %817 = vsyncpa [#allocation4], 1 }

</bundles_post_ra>
